<compile_context>
chip_gen: v7x
topology: tpu7x:2x2x1
jax: 0.10.0
libtpu: 0.0.40
codegen_flags: <defaults>
</compile_context>

<pallas_src>
import jax
import jax.numpy as jnp
from jax.experimental import pallas as pl
from jax.experimental.pallas import tpu as pltpu


def se_basic_block_kernel(x_ref, w12_ref, t12_ref, se_ref, o_ref):
    # Per grid step:
    #   x_ref  : (Bt, L, C)  bf16 lane-dense activations (channels on lanes)
    #   w12_ref: (2, P, C)   bf16 conv1/conv2 weights, BN scale folded, (out,in)
    #   t12_ref: (2, P)      f32 folded BN1/BN2 shifts
    #   se_ref : (2H, P)     bf16 [fc[0].weight ; fc[2].weight.T]
    #   o_ref  : (Bt, L, P)
    Bt, L, C = x_ref.shape
    P = o_ref.shape[-1]
    H = se_ref.shape[0] // 2
    f32 = jnp.float32

    # Contraction patterns (no transposed weight copies in the hot path).
    nt = (((1,), (1,)), ((), ()))    # (M,K)·(N,K) -> (M,N)  PyTorch (out,in)
    nn_ = (((1,), (0,)), ((), ()))   # (M,K)·(K,N) -> (M,N)

    x = x_ref[...]                                   # (Bt, L, C) bf16
    x2d = x.reshape(Bt * L, C)                       # fold batch into MXU rows

    t12 = t12_ref[...]                               # (2, P) f32
    t1 = t12[0:1]
    t2 = t12[1:2]

    # conv1 (1x1, BN1 scale pre-folded) + BN1 shift + ReLU
    h = jax.lax.dot_general(x2d, w12_ref[0], nt, preferred_element_type=f32)
    h = jnp.maximum(h + t1, 0.0)                     # (Bt*L, P) f32

    # conv2 (1x1, BN2 scale pre-folded) + BN2 shift
    h = jax.lax.dot_general(h.astype(w12_ref.dtype), w12_ref[1], nt,
                            preferred_element_type=f32)
    h = h + t2

    h3 = h.reshape(Bt, L, P)                         # per-sample view for SE
    y = jnp.mean(h3, axis=1)                         # (Bt, P) f32 avg-pool

    se_w = se_ref[...]                               # (2H, P) bf16
    wse1 = se_w[:H]                                  # (H, P)  fc[0].weight
    wse2t = se_w[H:]                                 # (H, P)  fc[2].weight.T

    # Squeeze-and-excitation gate, applied TWICE (matches the PyTorch forward).
    # Second pooling is hoisted: mean(h*g) == mean(h)*g for a per-channel gate.
    for it in range(2):
        g = jax.lax.dot_general(y.astype(wse1.dtype), wse1, nt,
                                preferred_element_type=f32)      # (Bt, H)
        g = jnp.maximum(g, 0.0)
        g = jax.lax.dot_general(g.astype(wse2t.dtype), wse2t, nn_,
                                preferred_element_type=f32)      # (Bt, P)
        g = jax.nn.sigmoid(g)
        h3 = h3 * g[:, None, :]                      # bcast over L
        if it == 0:
            y = y * g

    # Residual add (pre-block input) + final ReLU.
    out = jnp.maximum(h3 + x.astype(f32), 0.0)
    o_ref[...] = out.astype(o_ref.dtype)


def _pick_batch_tile(B, L):
    """Per-grid-step batch tile.

    Prefer >=2 grid steps (pipelining; v7x has 2 TensorCores to shard across)
    but only if each step still has >=128 matmul rows (a full MXU pass);
    otherwise take the whole batch so the fixed per-step cost isn't paid twice.
    """
    divisors = [d for d in range(1, B + 1) if B % d == 0]
    for d in divisors:
        if d * L >= 128 and B // d >= 2:
            return d
    for d in reversed(divisors):
        if d * L <= 1024:          # VMEM-safe row cap per step
            return d
    return 1


def se_basic_block(x, conv1_w, conv1_b, bn1, conv2_w, conv2_b, bn2,
                   se_w1, se_w2, *, eps=1e-5):
    """Fused SEBasicBlock forward (eval-mode BN).

    x       : (B, C, L)  NCL, PyTorch convention.
    conv*_w : (P, C, 1)  Conv1d weights (kernel_size=1), conv*_b: (P,)
    bn*     : (gamma, beta, running_mean, running_var), each (P,)
    se_w1   : (P//r, P)  se.fc[0].weight ;  se_w2: (P, P//r)  se.fc[2].weight
    """
    B, C, L = x.shape
    P = conv1_w.shape[0]
    H = se_w1.shape[0]
    assert conv1_w.shape[1] == C and conv2_w.shape == (P, P, 1)
    assert P == C, "residual path requires in_planes == planes (down_sample=None)"

    f32, bf16 = jnp.float32, jnp.bfloat16
    g1, be1, m1, v1 = bn1
    g2, be2, m2, v2 = bn2
    # Fold eval-mode BN: scale into the conv weight, (bias-mean)*scale+beta shift.
    s1 = (g1 / jnp.sqrt(v1 + eps)).astype(f32)
    t1 = ((conv1_b - m1) * s1 + be1).astype(f32)
    s2 = (g2 / jnp.sqrt(v2 + eps)).astype(f32)
    t2 = ((conv2_b - m2) * s2 + be2).astype(f32)

    w1 = (conv1_w[:, :, 0].astype(f32) * s1[:, None]).astype(bf16)   # (P, C)
    w2 = (conv2_w[:, :, 0].astype(f32) * s2[:, None]).astype(bf16)   # (P, P)
    w12 = jnp.stack([w1, w2])                                        # (2, P, C)
    t12 = jnp.stack([t1, t2])                                        # (2, P)
    se_w = jnp.concatenate([se_w1.astype(bf16),
                            se_w2.T.astype(bf16)], axis=0)           # (2H, P)

    # Lane-dense layout: channels -> lanes (C multiple of 128), L -> sublanes.
    x_t = jnp.transpose(x, (0, 2, 1)).astype(bf16)                   # (B, L, C)

    Bt = _pick_batch_tile(B, L)
    grid = (B // Bt,)

    out_t = pl.pallas_call(
        se_basic_block_kernel,
        out_shape=jax.ShapeDtypeStruct((B, L, P), x.dtype),
        grid_spec=pltpu.PrefetchScalarGridSpec(
            num_scalar_prefetch=0,
            grid=grid,                                  # pipeline over batch tiles
            in_specs=[
                pl.BlockSpec((Bt, L, C), lambda b: (b, 0, 0)),    # activations
                pl.BlockSpec((2, P, C), lambda b: (0, 0, 0)),     # conv weights
                pl.BlockSpec((2, P), lambda b: (0, 0)),           # BN shifts
                pl.BlockSpec((2 * H, P), lambda b: (0, 0)),       # SE weights
            ],
            out_specs=pl.BlockSpec((Bt, L, P), lambda b: (b, 0, 0)),
        ),
        compiler_params=pltpu.CompilerParams(
            dimension_semantics=("parallel",),          # megacore-shardable
        ),
    )(x_t, w12, t12, se_w)

    return jnp.transpose(out_t, (0, 2, 1))              # back to (B, C, L)


def reference_se_basic_block(x, conv1_w, conv1_b, bn1, conv2_w, conv2_b, bn2,
                             se_w1, se_w2, eps=1e-5):
    """Pure-JAX mirror of the PyTorch forward (eval-mode BN), in f32."""
    def bn(h, p):
        g, b, m, v = p
        return (h - m[None, :, None]) * (g / jnp.sqrt(v + eps))[None, :, None] \
               + b[None, :, None]

    def conv1x1(h, w, b):
        return jnp.einsum('bcl,pc->bpl', h, w[:, :, 0]) + b[None, :, None]

    def se(h):
        y = jnp.mean(h, axis=-1)                        # (B, P)
        g = jnp.maximum(y @ se_w1.T, 0.0)
        g = jax.nn.sigmoid(g @ se_w2.T)
        return h * g[:, :, None]

    out = jnp.maximum(bn(conv1x1(x, conv1_w, conv1_b), bn1), 0.0)
    out = bn(conv1x1(out, conv2_w, conv2_b), bn2)
    out = se(se(out))                                   # SE applied twice
    return jnp.maximum(out + x, 0.0)


if __name__ == "__main__":
    B, C, L = 2, 128, 16          # channels = 128 -> lane-dense; reduction 16 -> H=8
    reduction = 16
    H = C // reduction

    key = jax.random.PRNGKey(0)
    ks = jax.random.split(key, 15)

    def q(a):
        # Round params/activations to the bf16 grid (deterministic, bf16-friendly).
        return a.astype(jnp.bfloat16).astype(jnp.float32)

    x = q(jax.random.normal(ks[0], (B, C, L), jnp.float32))
    conv1_w = q(jax.random.normal(ks[1], (C, C, 1), jnp.float32) * (C ** -0.5))
    conv1_b = q(jax.random.normal(ks[2], (C,), jnp.float32) * 0.1)
    conv2_w = q(jax.random.normal(ks[3], (C, C, 1), jnp.float32) * (C ** -0.5))
    conv2_b = q(jax.random.normal(ks[4], (C,), jnp.float32) * 0.1)
    bn1 = (q(jax.random.uniform(ks[5], (C,), jnp.float32, 0.5, 1.5)),
           q(jax.random.normal(ks[6], (C,), jnp.float32) * 0.1),
           q(jax.random.normal(ks[7], (C,), jnp.float32) * 0.1),
           q(jax.random.uniform(ks[8], (C,), jnp.float32, 0.5, 1.5)))
    bn2 = (q(jax.random.uniform(ks[9], (C,), jnp.float32, 0.5, 1.5)),
           q(jax.random.normal(ks[10], (C,), jnp.float32) * 0.1),
           q(jax.random.normal(ks[11], (C,), jnp.float32) * 0.1),
           q(jax.random.uniform(ks[12], (C,), jnp.float32, 0.5, 1.5)))
    se_w1 = q(jax.random.uniform(ks[13], (H, C), jnp.float32,
                                 -(C ** -0.5), C ** -0.5))
    se_w2 = q(jax.random.uniform(ks[14], (C, H), jnp.float32,
                                 -(H ** -0.5), H ** -0.5))

    out = se_basic_block(x, conv1_w, conv1_b, bn1, conv2_w, conv2_b, bn2,
                         se_w1, se_w2)
    out = jax.block_until_ready(out)

    ref = reference_se_basic_block(x, conv1_w, conv1_b, bn1, conv2_w, conv2_b,
                                   bn2, se_w1, se_w2)
    assert out.shape == (B, C, L)
    # bf16 MXU operands (with BN scale folded into the weights) vs. an f32
    # reference -> tolerance widened accordingly (per review guidance).
    max_err = float(jnp.max(jnp.abs(out - ref)))
    assert jnp.allclose(out, ref, atol=5e-2, rtol=5e-2), f"max_err={max_err}"

    print("KERNEL_OK")
</pallas_src>

<mosaic_0001>
module attributes {stable_mosaic.version = 11 : i64} {
  func.func @se_basic_block_kernel(%arg0: i32, %arg1: memref<2x16x128xbf16, #tpu.memory_space<vmem>>, %arg2: memref<2x128x128xbf16, #tpu.memory_space<vmem>>, %arg3: memref<2x128xf32, #tpu.memory_space<vmem>>, %arg4: memref<16x128xbf16, #tpu.memory_space<vmem>>, %arg5: memref<2x16x128xf32, #tpu.memory_space<vmem>>) attributes {dimension_semantics = [#tpu.dimension_semantics<parallel>], iteration_bounds = array<i64: 1>, scalar_prefetch = 0 : i64, scratch_operands = 0 : i64, tpu.core_type = #tpu.core_type<tc>, window_params = [{transform_indices = @transform_0, window_bounds = array<i64: 2, 16, 128>}, {pipeline_mode = #tpu.pipeline_mode<synchronous>, transform_indices = @transform_1, window_bounds = array<i64: 2, 128, 128>}, {pipeline_mode = #tpu.pipeline_mode<synchronous>, transform_indices = @transform_2, window_bounds = array<i64: 2, 128>}, {pipeline_mode = #tpu.pipeline_mode<synchronous>, transform_indices = @transform_3, window_bounds = array<i64: 16, 128>}, {transform_indices = @transform_4, window_bounds = array<i64: 2, 16, 128>}]} {
    %c0 = arith.constant 0 : index
    %c0_0 = arith.constant 0 : index
    %c0_1 = arith.constant 0 : index
    %0 = vector.load %arg1[%c0, %c0_0, %c0_1] : memref<2x16x128xbf16, #tpu.memory_space<vmem>>, vector<2x16x128xbf16>
    %1 = vector.shape_cast %0 : vector<2x16x128xbf16> to vector<32x128xbf16>
    %c0_2 = arith.constant 0 : index
    %c0_3 = arith.constant 0 : index
    %2 = vector.load %arg3[%c0_2, %c0_3] : memref<2x128xf32, #tpu.memory_space<vmem>>, vector<2x128xf32>
    %3 = vector.extract_strided_slice %2 {offsets = [0, 0], sizes = [1, 128], strides = [1, 1]} : vector<2x128xf32> to vector<1x128xf32>
    %4 = vector.extract_strided_slice %2 {offsets = [1, 0], sizes = [1, 128], strides = [1, 1]} : vector<2x128xf32> to vector<1x128xf32>
    %c0_4 = arith.constant 0 : index
    %c0_5 = arith.constant 0 : index
    %c0_6 = arith.constant 0 : index
    %5 = vector.load %arg2[%c0_4, %c0_5, %c0_6] : memref<2x128x128xbf16, #tpu.memory_space<vmem>>, vector<1x128x128xbf16>
    %6 = vector.shape_cast %5 : vector<1x128x128xbf16> to vector<128x128xbf16>
    %cst = arith.constant dense<0.000000e+00> : vector<32x128xf32>
    %7 = tpu.matmul %1, %6, %cst {dimension_numbers = #tpu.dot_dimension_numbers<[1], [1], [0], [0], [0, 0, 1, 0], [], []>} : vector<32x128xbf16>, vector<128x128xbf16>, vector<32x128xf32> -> vector<32x128xf32>
    %8 = vector.broadcast %3 : vector<1x128xf32> to vector<32x128xf32>
    %9 = arith.addf %7, %8 : vector<32x128xf32>
    %cst_7 = arith.constant 0.000000e+00 : f32
    %10 = vector.broadcast %cst_7 : f32 to vector<32x128xf32>
    %11 = arith.maximumf %9, %10 : vector<32x128xf32>
    %12 = arith.truncf %11 : vector<32x128xf32> to vector<32x128xbf16>
    %c1 = arith.constant 1 : index
    %c0_8 = arith.constant 0 : index
    %c0_9 = arith.constant 0 : index
    %13 = vector.load %arg2[%c1, %c0_8, %c0_9] : memref<2x128x128xbf16, #tpu.memory_space<vmem>>, vector<1x128x128xbf16>
    %14 = vector.shape_cast %13 : vector<1x128x128xbf16> to vector<128x128xbf16>
    %cst_10 = arith.constant dense<0.000000e+00> : vector<32x128xf32>
    %15 = tpu.matmul %12, %14, %cst_10 {dimension_numbers = #tpu.dot_dimension_numbers<[1], [1], [0], [0], [0, 0, 1, 0], [], []>} : vector<32x128xbf16>, vector<128x128xbf16>, vector<32x128xf32> -> vector<32x128xf32>
    %16 = vector.broadcast %4 : vector<1x128xf32> to vector<32x128xf32>
    %17 = arith.addf %15, %16 : vector<32x128xf32>
    %18 = vector.shape_cast %17 : vector<32x128xf32> to vector<2x16x128xf32>
    %cst_11 = arith.constant dense<0.000000e+00> : vector<2x128xf32>
    %19 = vector.multi_reduction <add>, %18, %cst_11 [1] : vector<2x16x128xf32> to vector<2x128xf32>
    %cst_12 = arith.constant 1.600000e+01 : f32
    %20 = vector.broadcast %cst_12 : f32 to vector<2x128xf32>
    %21 = arith.divf %19, %20 : vector<2x128xf32>
    %c0_13 = arith.constant 0 : index
    %c0_14 = arith.constant 0 : index
    %22 = vector.load %arg4[%c0_13, %c0_14] : memref<16x128xbf16, #tpu.memory_space<vmem>>, vector<16x128xbf16>
    %23 = vector.extract_strided_slice %22 {offsets = [0, 0], sizes = [8, 128], strides = [1, 1]} : vector<16x128xbf16> to vector<8x128xbf16>
    %24 = vector.extract_strided_slice %22 {offsets = [8, 0], sizes = [8, 128], strides = [1, 1]} : vector<16x128xbf16> to vector<8x128xbf16>
    %25 = arith.truncf %21 : vector<2x128xf32> to vector<2x128xbf16>
    %cst_15 = arith.constant dense<0.000000e+00> : vector<2x8xf32>
    %26 = tpu.matmul %25, %23, %cst_15 {dimension_numbers = #tpu.dot_dimension_numbers<[1], [1], [0], [0], [0, 0, 1, 0], [], []>} : vector<2x128xbf16>, vector<8x128xbf16>, vector<2x8xf32> -> vector<2x8xf32>
    %cst_16 = arith.constant 0.000000e+00 : f32
    %27 = vector.broadcast %cst_16 : f32 to vector<2x8xf32>
    %28 = arith.maximumf %26, %27 : vector<2x8xf32>
    %29 = arith.truncf %28 : vector<2x8xf32> to vector<2x8xbf16>
    %cst_17 = arith.constant dense<0.000000e+00> : vector<2x128xf32>
    %30 = tpu.matmul %29, %24, %cst_17 {dimension_numbers = #tpu.dot_dimension_numbers<[1], [0], [0], [1], [0, 0, 1, 1], [], []>} : vector<2x8xbf16>, vector<8x128xbf16>, vector<2x128xf32> -> vector<2x128xf32>
    %31 = arith.negf %30 : vector<2x128xf32>
    %32 = math.exp %31 : vector<2x128xf32>
    %cst_18 = arith.constant 1.000000e+00 : f32
    %33 = vector.broadcast %cst_18 : f32 to vector<2x128xf32>
    %34 = arith.addf %33, %32 : vector<2x128xf32>
    %35 = arith.divf %33, %34 : vector<2x128xf32>
    %36 = vector.shape_cast %35 : vector<2x128xf32> to vector<2x1x128xf32>
    %37 = vector.broadcast %36 : vector<2x1x128xf32> to vector<2x16x128xf32>
    %38 = arith.mulf %18, %37 : vector<2x16x128xf32>
    %39 = arith.mulf %21, %35 : vector<2x128xf32>
    %40 = arith.truncf %39 : vector<2x128xf32> to vector<2x128xbf16>
    %cst_19 = arith.constant dense<0.000000e+00> : vector<2x8xf32>
    %41 = tpu.matmul %40, %23, %cst_19 {dimension_numbers = #tpu.dot_dimension_numbers<[1], [1], [0], [0], [0, 0, 1, 0], [], []>} : vector<2x128xbf16>, vector<8x128xbf16>, vector<2x8xf32> -> vector<2x8xf32>
    %cst_20 = arith.constant 0.000000e+00 : f32
    %42 = vector.broadcast %cst_20 : f32 to vector<2x8xf32>
    %43 = arith.maximumf %41, %42 : vector<2x8xf32>
    %44 = arith.truncf %43 : vector<2x8xf32> to vector<2x8xbf16>
    %cst_21 = arith.constant dense<0.000000e+00> : vector<2x128xf32>
    %45 = tpu.matmul %44, %24, %cst_21 {dimension_numbers = #tpu.dot_dimension_numbers<[1], [0], [0], [1], [0, 0, 1, 1], [], []>} : vector<2x8xbf16>, vector<8x128xbf16>, vector<2x128xf32> -> vector<2x128xf32>
    %46 = arith.negf %45 : vector<2x128xf32>
    %47 = math.exp %46 : vector<2x128xf32>
    %cst_22 = arith.constant 1.000000e+00 : f32
    %48 = vector.broadcast %cst_22 : f32 to vector<2x128xf32>
    %49 = arith.addf %48, %47 : vector<2x128xf32>
    %50 = arith.divf %48, %49 : vector<2x128xf32>
    %51 = vector.shape_cast %50 : vector<2x128xf32> to vector<2x1x128xf32>
    %52 = vector.broadcast %51 : vector<2x1x128xf32> to vector<2x16x128xf32>
    %53 = arith.mulf %38, %52 : vector<2x16x128xf32>
    %54 = arith.extf %0 : vector<2x16x128xbf16> to vector<2x16x128xf32>
    %55 = arith.addf %53, %54 : vector<2x16x128xf32>
    %cst_23 = arith.constant 0.000000e+00 : f32
    %56 = vector.broadcast %cst_23 : f32 to vector<2x16x128xf32>
    %57 = arith.maximumf %55, %56 : vector<2x16x128xf32>
    %c0_24 = arith.constant 0 : index
    %c0_25 = arith.constant 0 : index
    %c0_26 = arith.constant 0 : index
    %58 = vector.load %arg5[%c0_24, %c0_25, %c0_26] : memref<2x16x128xf32, #tpu.memory_space<vmem>>, vector<2x16x128xf32>
    tpu.vector_store %arg5[%c0_24, %c0_25, %c0_26], %57 {strides = array<i32>} : memref<2x16x128xf32, #tpu.memory_space<vmem>>, vector<2x16x128xf32>,
    return
  }
  func.func @transform_0(%arg0: i32) -> (i32, i32, i32) {
    %c0_i32 = arith.constant 0 : i32
    %c0_i32_0 = arith.constant 0 : i32
    %c0_i32_1 = arith.constant 0 : i32
    return %arg0, %c0_i32, %c0_i32_0 : i32, i32, i32
  }
  func.func @transform_1(%arg0: i32) -> (i32, i32, i32) {
    %c0_i32 = arith.constant 0 : i32
    %c0_i32_0 = arith.constant 0 : i32
    %c0_i32_1 = arith.constant 0 : i32
    %c0_i32_2 = arith.constant 0 : i32
    return %c0_i32, %c0_i32_0, %c0_i32_1 : i32, i32, i32
  }
  func.func @transform_2(%arg0: i32) -> (i32, i32) {
    %c0_i32 = arith.constant 0 : i32
    %c0_i32_0 = arith.constant 0 : i32
    %c0_i32_1 = arith.constant 0 : i32
    return %c0_i32, %c0_i32_0 : i32, i32
  }
  func.func @transform_3(%arg0: i32) -> (i32, i32) {
    %c0_i32 = arith.constant 0 : i32
    %c0_i32_0 = arith.constant 0 : i32
    %c0_i32_1 = arith.constant 0 : i32
    return %c0_i32, %c0_i32_0 : i32, i32
  }
  func.func @transform_4(%arg0: i32) -> (i32, i32, i32) {
    %c0_i32 = arith.constant 0 : i32
    %c0_i32_0 = arith.constant 0 : i32
    %c0_i32_1 = arith.constant 0 : i32
    return %arg0, %c0_i32, %c0_i32_0 : i32, i32, i32
  }
}

</mosaic_0001>

<bundles_post_ra>
// kernel: tpu_custom_call.1
= control target key start
LH: loop header
LB: loop body
LE: loop exit
PB: predicated region body
PF: predicated region fallthrough
CT: control target
= control target key end

     0   :  { %9 = vsyncpa [#allocation3], 0  ;;  %s994_s0 = inlined_call_operand.hbm [shape: bf16[2,16,128], index: 0, kind: input, shape index: {}]   ;;  %s995_s1 = inlined_call_operand.hbm [shape: bf16[2,128,128], index: 1, kind: input, shape index: {}]   ;;  %s996_s2 = inlined_call_operand.vmem [shape: f32[2,128], index: 2, kind: input, shape index: {}]   ;;  %s997_s3 = inlined_call_operand.vmem [shape: bf16[16,128], index: 3, kind: input, shape index: {}]   ;;  %s998_s4 = inlined_call_operand.hbm [shape: f32[2,16,128], index: 4, kind: output, shape index: {}]  }
   0x1   :  { %10 = vsyncpa [#allocation6], 0 }
   0x2   :  { %11 = vsyncpa [#allocation4], 0  ;;  %s868_s15 = smov [#allocation2]   ;;  %s796_s19 = scalar_lea.hbm %s994_s0, 256 }
   0x3   :  { %s17_s16 = sshll.u32 %s868_s15, 4  ;;  %p797_p0 = scmp.ne.s32.totalorder %s994_s0, %s796_s19  ;;  %s18_s16 = int_to_ptr.vmem [resolvable:$true] %s17_s16 }
   0x4   :  { %p800_p1 = scmp.lt.u32.totalorder %s796_s19, %s994_s0 }
   0x6   :  { %p802_p2 = pnand %p800_p1, %p797_p0 }
   0x8   :  { %805 = shalt.err (!%p802_p2)
}
   0x9   :  { %s806_s24 = scalar_lea.vmem %s18_s16, 256  ;;  %p811_p4 = scmp.lt.s32.totalorder %s18_s16, %s18_s16 }
   0xa   :  { %p807_p3 = scmp.ne.s32.totalorder %s18_s16, %s806_s24  ;;  %p812_p5 = scmp.lt.s32.totalorder %s806_s24, %s806_s24 }
   0xc   :  { %p813_p6 = por %p812_p5, %p811_p4 }
   0xe   :  { %p814_p7 = pnand %p813_p6, %p807_p3 }
  0x10   :  { %817 = shalt.err (!%p814_p7)
}
  0x11   :  { %s869_s25 = smov 64   ;;  %s870_s26 = smov 4  }
  0x12   :  { %23 = dma.hbm_to_vmem [thread:$0]  %s994_s0, 256, %s18_s16, [#allocation3], %s869_s25, %s869_s25, %s870_s26  }
  0x13   :  { %s871_s29 = smov [#allocation5]   ;;  %s818_s7 = scalar_lea.hbm %s995_s1, 2048 }
  0x14   :  { %s29_s30 = sshll.u32 %s871_s29, 4  ;;  %p819_p8 = scmp.ne.s32.totalorder %s995_s1, %s818_s7  ;;  %s30_s30 = int_to_ptr.vmem [resolvable:$true] %s29_s30 }
  0x15   :  { %p822_p9 = scmp.lt.u32.totalorder %s818_s7, %s995_s1 }
  0x17   :  { %p824_p10 = pnand %p822_p9, %p819_p8 }
  0x19   :  { %827 = shalt.err (!%p824_p10)
}
  0x1a   :  { %s828_s12 = scalar_lea.vmem %s30_s30, 2048  ;;  %p833_p12 = scmp.lt.s32.totalorder %s30_s30, %s30_s30 }
  0x1b   :  { %p829_p11 = scmp.ne.s32.totalorder %s30_s30, %s828_s12  ;;  %p834_p13 = scmp.lt.s32.totalorder %s828_s12, %s828_s12 }
  0x1d   :  { %p835_p0 = por %p834_p13, %p833_p12 }
  0x1f   :  { %p836_p1 = pnand %p835_p0, %p829_p11 }
  0x21   :  { %839 = shalt.err (!%p836_p1)
}
  0x22   :  { %35 = dma.hbm_to_vmem [thread:$0]  %s995_s1, 2048, %s30_s30, [#allocation6], %s869_s25, %s869_s25, %s870_s26  }
  0x23   :  { %862 = dma.done.wait [#allocation3], 256  }
  0x24   :  { %863 = vsyncadd [#allocation3], 4294967040 }
  0x25   :  { %864 = dma.done.wait [#allocation6], 2048  }
  0x26   :  { %865 = vsyncadd [#allocation6], 4294965248  ;;  %v768_v0 = vld [vmem:[#allocation5] sm:$0xff]   ;;  %v769_v1 = vld [vmem:[#allocation5 + $0x8] sm:$0xff]   ;;  %v68_v18 = vlaneseq  ;;  %v872_v37 = vmov 0.0   ;;  %vm873_vm0 = vmmov 0  }
  0x27   :  { %694 = vmatprep.subr.bf16.mxu0 %v768_v0  ;;  %v770_v2 = vld [vmem:[#allocation5 + $0x10] sm:$0xff]   ;;  %v778_v4 = vld [vmem:[#allocation5 + $0x40] sm:$0xff]   ;;  %v779_v5 = vld [vmem:[#allocation5 + $0x48] sm:$0xff]   ;;  %vm380_vm1 = vcmask 1043456   ;;  %vm330_vm2 = vcmask 1041409   ;;  %vm376_vm3 = vcmask 64512  }
  0x28   :  { %695 = vmatpush3.bf16.xpose.msra.mxu0 %v768_v0  ;;  %v927_v3 = vld [vmem:[#allocation2] sm:$0xff]   ;;  %714 = vmatprep.subr.bf16.mxu1 %v778_v4  ;;  %v771_v6 = vld [vmem:[#allocation5 + $0x18] sm:$0xff]   ;;  %v772_v8 = vld [vmem:[#allocation5 + $0x20] sm:$0xff]   ;;  %v933_v19 = vshrl.u32 %v68_v18, 7 }
  0x29   :  { %696 = vmatprep.subr.bf16.mxu0 %v769_v1  ;;  %710 = vmatprep.mubr.bf16.mxu0 %v927_v3  ;;  %v780_v7 = vld [vmem:[#allocation5 + $0x50] sm:$0xff]   ;;  %v781_v9 = vld [vmem:[#allocation5 + $0x58] sm:$0xff]   ;;  %v773_v10 = vld [vmem:[#allocation5 + $0x28] sm:$0xff]  }
  0x2a   :  { %715 = vmatpush3.bf16.xpose.msra.mxu1 %v778_v4  ;;  %v782_v11 = vld [vmem:[#allocation5 + $0x60] sm:$0xff]   ;;  %v774_v12 = vld [vmem:[#allocation5 + $0x30] sm:$0xff]   ;;  %v783_v13 = vld [vmem:[#allocation5 + $0x68] sm:$0xff]   ;;  %v936_v20 = vsub.s32 0, %v933_v19  ;;  %v206_v41 = vsub.s32 1, %v933_v19 }
  0x2b   :  { %716 = vmatprep.subr.bf16.mxu1 %v779_v5  ;;  %v775_v14 = vld [vmem:[#allocation5 + $0x38] sm:$0xff]   ;;  %v784_v15 = vld [vmem:[#allocation5 + $0x70] sm:$0xff]  }
  0x2c   :  { %v930_v16 = vld [vmem:[#allocation2 + $0x8] sm:$0xff]   ;;  %v51_v21 = vld [vmem:[%s996_s2] sm:$0x3]  ;;  %v323_v39 = vld [vmem:[%s997_s3 + $0x4] sm:$0xf] }
  0x2d   :  { %v785_v17 = vld [vmem:[#allocation5 + $0x78] sm:$0xff]   ;;  %v71_v22 = vrot.slane %v51_v21, %v936_v20  ;;  %v322_v38 = vld [vmem:[%s997_s3] sm:$0xf]  ;;  %v382_v40 = vsel %vm380_vm1, %v323_v39, 0  ;;  %v207_v42 = vrot.slane %v51_v21, %v206_v41  ;;  %s875_s3 = smov [#allocation7]  }
  0x2e   :  { %s631_s18 = sshll.u32 %s875_s3, 4  ;;  %s632_s18 = int_to_ptr.vmem [resolvable:$true] %s631_s18 }
  0x2f   :  { %s840_s19 = scalar_lea.vmem %s632_s18, 512  ;;  %p845_p3 = scmp.lt.s32.totalorder %s632_s18, %s632_s18 }
  0x30   :  { %697 = vmatpush3.bf16.xpose.msra.mxu0 %v769_v1  ;;  %p841_p2 = scmp.ne.s32.totalorder %s632_s18, %s840_s19  ;;  %p846_p4 = scmp.lt.s32.totalorder %s840_s19, %s840_s19 }
  0x31   :  { %698 = vmatprep.subr.bf16.mxu0 %v770_v2 }
  0x32   :  { %717 = vmatpush3.bf16.xpose.msra.mxu1 %v779_v5  ;;  %p847_p5 = por %p846_p4, %p845_p3 }
  0x33   :  { %718 = vmatprep.subr.bf16.mxu1 %v780_v7 }
  0x34   :  { %p848_p6 = pnand %p847_p5, %p841_p2 }
  0x38   :  { %699 = vmatpush3.bf16.xpose.msra.mxu0 %v770_v2 }
  0x39   :  { %700 = vmatprep.subr.bf16.mxu0 %v771_v6 }
  0x3a   :  { %719 = vmatpush3.bf16.xpose.msra.mxu1 %v780_v7 }
  0x3b   :  { %720 = vmatprep.subr.bf16.mxu1 %v781_v9 }
  0x40   :  { %701 = vmatpush3.bf16.xpose.msra.mxu0 %v771_v6 }
  0x41   :  { %702 = vmatprep.subr.bf16.mxu0 %v772_v8 }
  0x42   :  { %721 = vmatpush3.bf16.xpose.msra.mxu1 %v781_v9 }
  0x43   :  { %722 = vmatprep.subr.bf16.mxu1 %v782_v11 }
  0x48   :  { %703 = vmatpush3.bf16.xpose.msra.mxu0 %v772_v8 }
  0x49   :  { %704 = vmatprep.subr.bf16.mxu0 %v773_v10 }
  0x4a   :  { %723 = vmatpush3.bf16.xpose.msra.mxu1 %v782_v11 }
  0x4b   :  { %724 = vmatprep.subr.bf16.mxu1 %v783_v13 }
  0x50   :  { %705 = vmatpush3.bf16.xpose.msra.mxu0 %v773_v10 }
  0x51   :  { %706 = vmatprep.subr.bf16.mxu0 %v774_v12 }
  0x52   :  { %725 = vmatpush3.bf16.xpose.msra.mxu1 %v783_v13 }
  0x53   :  { %726 = vmatprep.subr.bf16.mxu1 %v784_v15 }
  0x58   :  { %707 = vmatpush3.bf16.xpose.msra.mxu0 %v774_v12 }
  0x59   :  { %708 = vmatprep.subr.bf16.mxu0 %v775_v14 }
  0x5a   :  { %727 = vmatpush3.bf16.xpose.msra.mxu1 %v784_v15 }
  0x5b   :  { %728 = vmatprep.subr.bf16.mxu1 %v785_v17 }
  0x60   :  { %709 = vmatpush3.bf16.xpose.msra.mxu0 %v775_v14 }
  0x61   :  { %734 = vmatprep.subr.bf16.mxu0 %v872_v37 }
  0x62   :  { %729 = vmatpush3.bf16.xpose.msra.mxu1 %v785_v17 }
  0x63   :  { %740 = vmatprep.subr.bf16.mxu1 %v872_v37 }
  0x67   :  { %711 = vmatmul.mubr.bf16.vlgmr.msra.gmra.mrb[0].mxu0 %v930_v16 }
  0x68   :  { %735 = vmatpush3.bf16.xpose.msra.mxu0 %v322_v38  ;;  %736 = vmatprep.mubr.msk.bf16.mxu0 %vm873_vm0, %v872_v37 }
  0x69   :  { %746 = vmatprep.subr.bf16.mxu0 %v872_v37 }
 0x13a   :  { %v712_v23 = vpop.f32.mrb[0].mxu0 }
 0x13b   :  { %v175_v24 = vadd.f32 %v712_v23, %v71_v22  ;;  %v166_v25 = vpop.f32.mrb[1].mxu0 }
 0x13c   :  { %v167_v26 = vadd.f32 %v166_v25, %v71_v22  ;;  %v713_v27 = vpop.f32.mrb[2].mxu0 }
 0x13d   :  { %v178_v28 = vadd.f32 %v713_v27, %v71_v22  ;;  %v169_v29 = vpop.f32.mrb[3].mxu0  ;;  %v183_v31 = vmax.f32 %v175_v24, 0.0 }
 0x13e   :  { %v170_v30 = vadd.f32 %v169_v29, %v71_v22  ;;  %v181_v33 = vmax.f32 %v167_v26, 0.0 }
 0x13f   :  { %v184_v32 = vmax.f32 %v178_v28, 0.0 }
 0x140   :  { %v182_v34 = vmax.f32 %v170_v30, 0.0 }
 0x141   :  { %v186_v35 = vpack.c.bf16 %v184_v32, %v183_v31 }
 0x142   :  { %v185_v36 = vpack.c.bf16 %v182_v34, %v181_v33 }
 0x144   :  { %730 = vmatprep.mubr.bf16.mxu1 %v185_v36 }
 0x145   :  { %731 = vmatmul.mubr.bf16.vlgmr.msra.gmra.mrb[0].mxu1 %v186_v35 }
 0x146   :  { %742 = vmatprep.mubr.msk.bf16.mxu1 %vm873_vm0, %v872_v37  ;;  %741 = vmatpush3.bf16.msra.mxu1 %v382_v40 }
 0x147   :  { %752 = vmatprep.subr.bf16.mxu1 %v872_v37 }
 0x218   :  { %v732_v43 = vpop.f32.mrb[0].mxu1 }
 0x219   :  { %v290_v44 = vpop.f32.mrb[1].mxu1  ;;  %v951_v46 = vadd.f32 %v732_v43, %v207_v42 }
 0x21a   :  { %v733_v45 = vpop.f32.mrb[2].mxu1  ;;  %v955_v49 = vadd.f32 %v290_v44, %v207_v42 }
 0x21b   :  { %v953_v47 = vadd.f32 %v733_v45, %v207_v42  ;;  %v293_v48 = vpop.f32.mrb[3].mxu1 }
 0x21c   :  { %v957_v50 = vadd.f32 %v293_v48, %v207_v42 }
 0x21d   :  { %v312_v51 = vadd.f32 %v953_v47, %v951_v46 }
 0x21e   :  { %v305_v52 = vadd.f32 %v957_v50, %v955_v49 }
 0x21f   :  { %v313_v53 = vrot.slane %v312_v51, 4 }
 0x220   :  { %v306_v54 = vrot.slane %v305_v52, 4 }
 0x221   :  { %v314_v55 = vadd.f32 %v313_v53, %v312_v51 }
 0x222   :  { %v307_v56 = vadd.f32 %v306_v54, %v305_v52  ;;  %v874_v52 = vmov 1966171168  }
 0x223   :  { %v315_v57 = vrot.slane %v314_v55, 2  ;;  %v432_v53 = vunpack.c.l.s4 %v874_v52 }
 0x224   :  { %v308_v58 = vrot.slane %v307_v56, 2 }
 0x225   :  { %v316_v59 = vadd.f32 %v315_v57, %v314_v55  ;;  %v433_v54 = vunpack.c.0.s8 %v432_v53 }
 0x226   :  { %v309_v60 = vadd.f32 %v308_v58, %v307_v56 }
 0x227   :  { %v317_v61 = vrot.slane %v316_v59, 1  ;;  %v436_v55 = vsub.s32 %v433_v54, %v933_v19 }
 0x228   :  { %v310_v62 = vrot.slane %v309_v60, 1 }
 0x229   :  { %v318_v63 = vadd.f32 %v317_v61, %v316_v59 }
 0x22a   :  { %v311_v0 = vadd.f32 %v310_v62, %v309_v60 }
 0x22b   :  { %v321_v1 = vmul.f32 0.0625, %v318_v63 }
 0x22c   :  { %v320_v2 = vmul.f32 0.0625, %v311_v0 }
 0x22d   :  { %v325_v4 = vpack.c.bf16 %v321_v1, %v321_v1 }
 0x22e   :  { %v324_v5 = vpack.c.bf16 %v320_v2, %v320_v2 }
 0x22f   :  { %v329_v6 = vunpack.c.l.b16 %v325_v4 }
 0x230   :  { %v328_v7 = vunpack.c.l.b16 %v324_v5  ;;  %v610_v5 = vunpack.c.l.bf16 %v927_v3 }
 0x232   :  { %v331_v8 = vsel %vm330_vm2, %v329_v6, %v328_v7  ;;  %v611_v6 = vunpack.c.h.bf16 %v927_v3 }
 0x233   :  { %v332_v9 = vpack.c.b16 %v331_v8, %v331_v8 }
 0x235   :  { %737 = vmatmul.mubr.bf16.vlgmr.msra.gmra.mrb[4].mxu0 %v332_v9 }
 0x236   :  { %747 = vmatpush3.bf16.xpose.msra.mxu0 %v322_v38  ;;  %748 = vmatprep.mubr.msk.bf16.mxu0 %vm873_vm0, %v872_v37 }
 0x308   :  { %v368_v10 = vpop.f32.mrb[4].mxu0 }
 0x309   :  { %v374_v11 = vmax.f32 %v368_v10, 0.0  ;;  %v738_v12 = vpop.f32.mrb[5].mxu0  ;;  %v612_v10 = vunpack.c.l.bf16 %v930_v16 }
 0x30a   :  { %v371_v13 = vpop.f32.mrb[6].mxu0 }
 0x30b   :  { %v375_v14 = vpack.c.bf16 %v374_v11, %v374_v11  ;;  %v739_v15 = vpop.f32.mrb[7].mxu0  ;;  %v613_v11 = vunpack.c.h.bf16 %v930_v16 }
 0x30d   :  { %743 = vmatmul.mubr.msk.bf16.vlgmr.msra.gmra.mrb[4].mxu1 %vm376_vm3, %v375_v14 }
 0x30e   :  { %753 = vmatpush3.bf16.msra.mxu1 %v382_v40  ;;  %754 = vmatprep.mubr.msk.bf16.mxu1 %vm873_vm0, %v872_v37 }
 0x3e0   :  { %v418_v17 = vpop.f32.mrb[4].mxu1 }
 0x3e1   :  { %v663_v18 = vmul.f32 -1.442695, %v418_v17  ;;  %v744_v21 = vpop.f32.mrb[5].mxu1 }
 0x3e2   :  { %v421_v22 = vpop.f32.mrb[6].mxu1 }
 0x3e3   :  { %788 = vpow2.f32 %v663_v18  ;;  %v745_v23 = vpop.f32.mrb[7].mxu1 }
 0x3ed   :  { %v789_v24 = vpop.eup %788 }
 0x3ee   :  { %v427_v25 = vadd.f32 1.0, %v789_v24 }
 0x3f0   :  { %790 = vrcp.f32 %v427_v25 }
 0x3fa   :  { %v791_v26 = vpop.eup %790 }
 0x3fb   :  { %v467_v27 = vrot.slane %v791_v26, 1  ;;  %v470_v28 = vmul.f32 %v791_v26, %v320_v2  ;;  %v437_v58 = vrot.slane %v791_v26, %v436_v55 }
 0x3fd   :  { %v471_v29 = vmul.f32 %v467_v27, %v321_v1  ;;  %v472_v30 = vpack.c.bf16 %v470_v28, %v470_v28  ;;  %v438_v59 = vcombine.high %v437_v58, %v437_v58  ;;  %v445_v60 = vrot.slane %v437_v58, %v436_v55 }
 0x3ff   :  { %v473_v31 = vpack.c.bf16 %v471_v29, %v471_v29  ;;  %v476_v33 = vunpack.c.l.b16 %v472_v30  ;;  %v452_v61 = vrot.slane %v438_v59, %v436_v55  ;;  %v456_v0 = vrot.slane %v445_v60, %v936_v20 }
 0x401   :  { %v477_v32 = vunpack.c.l.b16 %v473_v31  ;;  %v460_v1 = vrot.slane %v452_v61, %v936_v20  ;;  %v463_v8 = vmul.f32 %v456_v0, %v955_v49  ;;  %v464_v9 = vmul.f32 %v456_v0, %v957_v50 }
 0x403   :  { %v478_v34 = vrot.slane %v477_v32, 7  ;;  %v465_v12 = vmul.f32 %v460_v1, %v951_v46  ;;  %v466_v14 = vmul.f32 %v460_v1, %v953_v47 }
 0x405   :  { %v479_v35 = vsel %vm330_vm2, %v478_v34, %v476_v33 }
 0x406   :  { %v480_v36 = vpack.c.b16 %v479_v35, %v479_v35 }
 0x408   :  { %749 = vmatmul.mubr.bf16.vlgmr.msra.gmra.mrb[8].mxu0 %v480_v36 }
 0x4db   :  { %v516_v37 = vpop.f32.mrb[8].mxu0 }
 0x4dc   :  { %v522_v38 = vmax.f32 %v516_v37, 0.0  ;;  %v750_v39 = vpop.f32.mrb[9].mxu0 }
 0x4dd   :  { %v519_v40 = vpop.f32.mrb[10].mxu0 }
 0x4de   :  { %v523_v41 = vpack.c.bf16 %v522_v38, %v522_v38  ;;  %v751_v42 = vpop.f32.mrb[11].mxu0 }
 0x4e0   :  { %755 = vmatmul.mubr.msk.bf16.vlgmr.msra.gmra.mrb[8].mxu1 %vm376_vm3, %v523_v41 }
 0x5b3   :  { %v561_v43 = vpop.f32.mrb[8].mxu1 }
 0x5b4   :  { %v665_v44 = vmul.f32 -1.442695, %v561_v43  ;;  %v756_v45 = vpop.f32.mrb[9].mxu1 }
 0x5b5   :  { %v564_v48 = vpop.f32.mrb[10].mxu1 }
 0x5b6   :  { %792 = vpow2.f32 %v665_v44  ;;  %v757_v51 = vpop.f32.mrb[11].mxu1 }
 0x5c0   :  { %v793_v56 = vpop.eup %792 }
 0x5c1   :  { %v570_v57 = vadd.f32 1.0, %v793_v56 }
 0x5c3   :  { %794 = vrcp.f32 %v570_v57 }
 0x5cd   :  { %v795_v62 = vpop.eup %794 }
 0x5ce   :  { %v580_v63 = vrot.slane %v795_v62, %v436_v55 }
 0x5d0   :  { %v581_v2 = vcombine.high %v580_v63, %v580_v63  ;;  %v588_v4 = vrot.slane %v580_v63, %v436_v55 }
 0x5d2   :  { %v595_v19 = vrot.slane %v581_v2, %v436_v55  ;;  %v599_v7 = vrot.slane %v588_v4, %v936_v20 }
 0x5d4   :  { %v603_v13 = vrot.slane %v595_v19, %v936_v20  ;;  %v606_v15 = vmul.f32 %v599_v7, %v463_v8  ;;  %v607_v17 = vmul.f32 %v599_v7, %v464_v9 }
 0x5d6   :  { %v608_v3 = vmul.f32 %v603_v13, %v465_v12  ;;  %v609_v18 = vmul.f32 %v603_v13, %v466_v14  ;;  %v614_v21 = vadd.f32 %v610_v5, %v606_v15  ;;  %v615_v22 = vadd.f32 %v611_v6, %v607_v17 }
 0x5d8   :  { %v616_v49 = vadd.f32 %v612_v10, %v608_v3  ;;  %v617_v50 = vadd.f32 %v613_v11, %v609_v18  ;;  %v618_v23 = vmax.f32 %v614_v21, 0.0  ;;  %v619_v24 = vmax.f32 %v615_v22, 0.0 }
 0x5da   :  { %v620_v16 = vmax.f32 %v616_v49, 0.0  ;;  %v621_v25 = vmax.f32 %v617_v50, 0.0  ;;  %622 = vst [vmem:[#allocation7] sm:$0xff] %v618_v23  ;;  %623 = vst [vmem:[#allocation7 + $0x8] sm:$0xff] %v619_v24 }
 0x5dc   :  { %624 = vst [vmem:[#allocation7 + $0x10] sm:$0xff] %v620_v16  ;;  %625 = vst [vmem:[#allocation7 + $0x18] sm:$0xff] %v621_v25 }
 0x5dd   :  { %851 = shalt.err (!%p848_p6)
}
 0x5de   :  { %s852_s22 = scalar_lea.hbm %s998_s4, 512 }
 0x5df   :  { %p853_p7 = scmp.ne.s32.totalorder %s998_s4, %s852_s22  ;;  %p856_p8 = scmp.lt.u32.totalorder %s852_s22, %s998_s4 }
 0x5e1   :  { %p858_p9 = pnand %p856_p8, %p853_p7 }
 0x5e3   :  { %861 = shalt.err (!%p858_p9)
}
 0x5e4   :  { %s876_s27 = smov 128   ;;  %s877_s28 = smov 8  }
 0x5e5   :  { %637 = dma.vmem_to_hbm [thread:$0]  %s632_s18, 512, %s998_s4, [#allocation4], %s876_s27, %s876_s27, %s877_s28  }
 0x5e6   :  { %866 = dma.done.wait [#allocation4], 512  }
 0x5e7   :  { %867 = vsyncadd [#allocation4], 4294966784 }
 0x5e8   :  { %641 = vsyncpa [#allocation3], 1 }
 0x5e9   :  { %642 = vsyncpa [#allocation6], 1 }
 0x5ea   :  { %643 = vsyncpa [#allocation4], 1 }

</bundles_post_ra>
